<compile_context>
chip_gen: v6e
topology: v6e:2x2x1
jax: 0.10.0
libtpu: 0.0.40
codegen_flags: <defaults>
</compile_context>

<pallas_src>
import functools

import jax
import jax.numpy as jnp
from jax import lax
from jax.experimental import pallas as pl
from jax.experimental.pallas import tpu as pltpu

EPS = 1e-5  # PyTorch LayerNorm default


def _layer_norm(x, g, b):
    mu = jnp.mean(x, axis=-1, keepdims=True)
    var = jnp.mean((x - mu) ** 2, axis=-1, keepdims=True)
    return (x - mu) * lax.rsqrt(var + EPS) * g + b


def _mm_bf16(a, b):
    # bf16 MXU operands, f32 accumulation (mirrors the kernels) -- reference use.
    return jnp.dot(a.astype(jnp.bfloat16), b.astype(jnp.bfloat16),
                   preferred_element_type=jnp.float32)


# ---------------------------------------------------------------------------
# Kernel 1: fused text transformer (all layers, one pallas_call)
# ---------------------------------------------------------------------------
def _clip_block_kernel(x_ref, pos_ref,
                       ln1_g, ln1_b, w_qkv, b_qkv, w_o, b_o,
                       ln2_g, ln2_b, w_fc, b_fc, w_pr, b_pr,
                       o_ref, *, num_heads, tb):
    """One grid step = one batch tile x one transformer layer.

    The residual stream is carried in the output block: its block index is the
    same for every layer, so it stays resident in VMEM across the whole
    'arbitrary' layer axis and never round-trips HBM between layers.
    """
    layer = pl.program_id(1)

    @pl.when(layer == 0)
    def _():
        # fold `prompts + positional_embedding` into the first layer step
        o_ref[...] = x_ref[...] + pos_ref[...]

    x = o_ref[...].astype(jnp.float32)                  # (TB, S, D)
    TB, S, D = x.shape
    H = num_heads
    hd = D // H
    scale = 1.0 / float(hd) ** 0.5
    bf16 = jnp.bfloat16

    # causal mask (CLIP build_attention_mask), hoisted out of the tb loop
    row = lax.broadcasted_iota(jnp.int32, (S, S), 0)
    col = lax.broadcasted_iota(jnp.int32, (S, S), 1)
    causal = col <= row

    # ---- multi-head causal self-attention on LN1(x) -------------------------
    h = _layer_norm(x, ln1_g[0], ln1_b[0])              # f32
    # One fused QKV matmul over all TB*S tokens.  h is transposed once so q/k/v
    # come out head-major with layout-trivial (leading-dim) reshapes: no weight
    # transposes and no per-head lane concatenation inside the kernel.
    ht = h.reshape(TB * S, D).T                          # (D, TB*S)  f32
    qkv = jnp.dot(w_qkv[0], ht.astype(bf16),
                  preferred_element_type=jnp.float32) + b_qkv[0]   # (3D, TB*S) f32
    q = qkv[0 * D:1 * D].reshape(H, hd, TB * S)
    k = qkv[1 * D:2 * D].reshape(H, hd, TB * S)
    v = qkv[2 * D:3 * D].reshape(H, hd, TB * S)
    wo = w_o[0]                                          # (H, hd, D)  bf16

    attn_rows = []
    for t in range(tb):                                  # short, unrolled
        lo, hi = t * S, (t + 1) * S
        qh = q[:, :, lo:hi].astype(bf16)                 # (H, hd, S)
        kh = k[:, :, lo:hi].astype(bf16)
        vh = v[:, :, lo:hi].astype(bf16)
        # head-batched score contraction: (H, Sq, Sk)
        s = lax.dot_general(qh, kh, (((1,), (1,)), ((0,), (0,))),
                            preferred_element_type=jnp.float32) * scale
        s = jnp.where(causal[None], s, -1e30)
        s = s - jnp.max(s, axis=-1, keepdims=True)
        p = jnp.exp(s)
        p = p * pl.reciprocal(jnp.sum(p, axis=-1, keepdims=True), approx=True)
        # P @ V, head-batched: (H, Sq, hd)
        o_h = lax.dot_general(p.astype(bf16), vh, (((2,), (2,)), ((0,), (0,))),
                              preferred_element_type=jnp.float32)
        # output projection contracting (H, hd) against w_o -- no head concat
        part = lax.dot_general(o_h.astype(bf16), wo, (((2,), (1,)), ((0,), (0,))),
                               preferred_element_type=jnp.float32)   # (H, S, D)
        attn_rows.append(jnp.sum(part, axis=0))                      # (S, D)
    attn = jnp.stack(attn_rows, axis=0) + b_o[0]          # (TB, S, D)
    x = x + attn

    # ---- MLP with QuickGELU --------------------------------------------------
    h2 = _layer_norm(x, ln2_g[0], ln2_b[0]).reshape(TB * S, D).astype(bf16)
    fc = jnp.dot(h2, w_fc[0], preferred_element_type=jnp.float32) + b_fc[0]
    fc = fc * jax.nn.sigmoid(1.702 * fc)                  # QuickGELU (f32)
    mlp = jnp.dot(fc.astype(bf16), w_pr[0],
                  preferred_element_type=jnp.float32) + b_pr[0]
    x = x + mlp.reshape(TB, S, D)

    o_ref[...] = x.astype(o_ref.dtype)


def text_transformer(x, pos, blocks, *, num_heads, tb):
    B, S, D = x.shape
    L = blocks["w_qkv"].shape[0]
    assert B % tb == 0

    def wspec(arr):
        rest = arr.shape[1:]
        n = len(rest)
        return pl.BlockSpec((1,) + rest, lambda b, l, _n=n: (l,) + (0,) * _n)

    names = ["ln1_g", "ln1_b", "w_qkv", "b_qkv", "w_o", "b_o",
             "ln2_g", "ln2_b", "w_fc", "b_fc", "w_pr", "b_pr"]
    kernel = functools.partial(_clip_block_kernel, num_heads=num_heads, tb=tb)
    return pl.pallas_call(
        kernel,
        out_shape=jax.ShapeDtypeStruct((B, S, D), jnp.float32),
        grid=(B // tb, L),
        in_specs=[pl.BlockSpec((tb, S, D), lambda b, l: (b, 0, 0)),
                  pl.BlockSpec((S, D), lambda b, l: (0, 0))]
                 + [wspec(blocks[n]) for n in names],
        out_specs=pl.BlockSpec((tb, S, D), lambda b, l: (b, 0, 0)),
        compiler_params=pltpu.CompilerParams(
            dimension_semantics=("parallel", "arbitrary")),
    )(x, pos, *[blocks[n] for n in names])


# ---------------------------------------------------------------------------
# Kernel 2: CLIP-Adapter (two bias-free Linears + ReLU), fused with ratio blend
# ---------------------------------------------------------------------------
def _adapter_kernel(x_ref, w1_ref, w2_ref, o_ref, *, ratio):
    x = x_ref[...]
    h = jnp.maximum(jnp.dot(x.astype(jnp.bfloat16), w1_ref[...],
                            preferred_element_type=jnp.float32), 0.0)
    a = jnp.maximum(jnp.dot(h.astype(jnp.bfloat16), w2_ref[...],
                            preferred_element_type=jnp.float32), 0.0)
    o_ref[...] = (ratio * a + (1.0 - ratio) * x).astype(o_ref.dtype)


def adapter(x, w1, w2, ratio):
    B, C = x.shape
    r = w1.shape[1]
    return pl.pallas_call(
        functools.partial(_adapter_kernel, ratio=ratio),
        out_shape=jax.ShapeDtypeStruct((B, C), x.dtype),
        in_specs=[pl.BlockSpec((B, C), lambda: (0, 0)),
                  pl.BlockSpec((C, r), lambda: (0, 0)),
                  pl.BlockSpec((r, C), lambda: (0, 0))],
        out_specs=pl.BlockSpec((B, C), lambda: (0, 0)),
    )(x, w1, w2)


# ---------------------------------------------------------------------------
# Forward pass (CustomCLIP minus the ViT image tower)
# ---------------------------------------------------------------------------
def build_prompts(params):
    n_cls = params["token_prefix"].shape[0]
    ctx = jnp.broadcast_to(params["ctx"][None], (n_cls,) + params["ctx"].shape)
    return jnp.concatenate([params["token_prefix"], ctx, params["token_suffix"]],
                           axis=1)


def text_encoder(prompts, tokenized_prompts, params, *, num_heads, tb):
    x = text_transformer(prompts, params["pos"], params["blocks"],
                         num_heads=num_heads, tb=tb)
    # ln_final + EOT gather + text_projection on B rows only: kept in plain XLA
    # (a Pallas call here would just be a masked <128-lane store, see review).
    B = x.shape[0]
    eot = jnp.argmax(tokenized_prompts, axis=-1)
    xe = x[jnp.arange(B), eot]
    xe = _layer_norm(xe, params["lnf_g"], params["lnf_b"])
    return xe @ params["text_proj"]


def custom_clip_forward(image_features, tokenized_prompts, params, *,
                        num_heads, tb, ratio):
    # TODO(synk): clip_model.visual (the CLIP ViT image encoder) is out of scope;
    # `image_features` are taken as a precomputed input.
    img_adapt = adapter(image_features, params["adapt_w1"], params["adapt_w2"], ratio)
    prompts = build_prompts(params)
    text_features = text_encoder(prompts, tokenized_prompts, params,
                                 num_heads=num_heads, tb=tb)
    img_n = img_adapt / jnp.linalg.norm(img_adapt, axis=-1, keepdims=True)
    txt_n = text_features / jnp.linalg.norm(text_features, axis=-1, keepdims=True)
    logits = jnp.exp(params["logit_scale"]) * img_n @ txt_n.T
    return logits, img_n, txt_n


# ---------------------------------------------------------------------------
# Pure-JAX reference (same math / same bf16 operand casts)
# ---------------------------------------------------------------------------
def reference_text_encoder(prompts, tokenized_prompts, params, *, num_heads):
    bf16 = jnp.bfloat16
    B, S, D = prompts.shape
    H = num_heads
    hd = D // H
    blk = params["blocks"]
    L = blk["w_qkv"].shape[0]
    x = prompts + params["pos"][None]
    causal = jnp.tril(jnp.ones((S, S), bool))
    for l in range(L):
        h = _layer_norm(x, blk["ln1_g"][l, 0], blk["ln1_b"][l, 0])
        qkv = _mm_bf16(h.reshape(B * S, D), blk["w_qkv"][l].T) + blk["b_qkv"][l][:, 0]
        qkv = qkv.reshape(B, S, 3, H, hd)
        q = qkv[:, :, 0].transpose(0, 2, 1, 3)        # (B, H, S, hd)
        k = qkv[:, :, 1].transpose(0, 2, 1, 3)
        v = qkv[:, :, 2].transpose(0, 2, 1, 3)
        s = jnp.einsum("bhqd,bhkd->bhqk", q.astype(bf16), k.astype(bf16),
                       preferred_element_type=jnp.float32) / jnp.sqrt(float(hd))
        s = jnp.where(causal, s, -1e30)
        a = jax.nn.softmax(s, axis=-1)
        o = jnp.einsum("bhqk,bhkd->bhqd", a.astype(bf16), v.astype(bf16),
                       preferred_element_type=jnp.float32)
        o = jnp.einsum("bhqd,hde->bqe", o.astype(bf16), blk["w_o"][l].astype(bf16),
                       preferred_element_type=jnp.float32)
        x = x + o + blk["b_o"][l]
        h2 = _layer_norm(x, blk["ln2_g"][l, 0], blk["ln2_b"][l, 0])
        fc = _mm_bf16(h2.reshape(B * S, D), blk["w_fc"][l]) + blk["b_fc"][l, 0]
        fc = fc * jax.nn.sigmoid(1.702 * fc)
        mlp = _mm_bf16(fc, blk["w_pr"][l]) + blk["b_pr"][l, 0]
        x = x + mlp.reshape(B, S, D)
    eot = jnp.argmax(tokenized_prompts, axis=-1)
    xe = x[jnp.arange(B), eot]
    xe = _layer_norm(xe, params["lnf_g"], params["lnf_b"])
    return xe @ params["text_proj"]


def reference_forward(image_features, tokenized_prompts, params, *, num_heads, ratio):
    h = jnp.maximum(_mm_bf16(image_features, params["adapt_w1"]), 0.0)
    a = jnp.maximum(_mm_bf16(h, params["adapt_w2"]), 0.0)
    imf = ratio * a + (1.0 - ratio) * image_features
    prompts = build_prompts(params)
    tf = reference_text_encoder(prompts, tokenized_prompts, params,
                                num_heads=num_heads)
    imf = imf / jnp.linalg.norm(imf, axis=-1, keepdims=True)
    tf = tf / jnp.linalg.norm(tf, axis=-1, keepdims=True)
    logits = jnp.exp(params["logit_scale"]) * imf @ tf.T
    return logits, imf, tf


# ---------------------------------------------------------------------------
# Synthetic parameters (deterministic, host-side weight layouts)
# ---------------------------------------------------------------------------
def init_params(key, *, L, D, P, S, H, n_cls, n_ctx, C_img, reduction=4):
    ks = iter(jax.random.split(key, 64))
    std = 0.05
    bf16 = jnp.bfloat16

    def rnd(shape, scale=std, dtype=jnp.float32):
        return (scale * jax.random.normal(next(ks), shape, jnp.float32)).astype(dtype)

    blocks = {
        "ln1_g": 1.0 + rnd((L, 1, D), 0.1),
        "ln1_b": rnd((L, 1, D)),
        # weight layouts chosen on the host so the kernel never transposes them
        "w_qkv": rnd((L, 3 * D, D), dtype=bf16),        # used as  W_qkv @ h^T
        "b_qkv": rnd((L, 3 * D, 1)),
        "w_o":   rnd((L, H, D // H, D), dtype=bf16),    # (head, head_dim, D_out)
        "b_o":   rnd((L, 1, D)),
        "ln2_g": 1.0 + rnd((L, 1, D), 0.1),
        "ln2_b": rnd((L, 1, D)),
        "w_fc":  rnd((L, D, 4 * D), dtype=bf16),        # (in, out)
        "b_fc":  rnd((L, 1, 4 * D)),
        "w_pr":  rnd((L, 4 * D, D), dtype=bf16),        # (in, out)
        "b_pr":  rnd((L, 1, D)),
    }
    params = {
        "blocks": blocks,
        "pos": rnd((S, D)),
        "lnf_g": 1.0 + rnd((D,), 0.1),
        "lnf_b": rnd((D,)),
        "text_proj": rnd((D, P)),
        # PromptLearner buffers / parameter
        "ctx": rnd((n_ctx, D)),
        "token_prefix": rnd((n_cls, 1, D)),
        "token_suffix": rnd((n_cls, S - 1 - n_ctx, D)),
        # CLIP-Adapter (bias-free Linears, stored (in, out))
        "adapt_w1": rnd((C_img, C_img // reduction), dtype=bf16),
        "adapt_w2": rnd((C_img // reduction, C_img), dtype=bf16),
        "logit_scale": jnp.float32(jnp.log(1.0 / 0.07)),
    }
    return params


if __name__ == "__main__":
    # toy shapes: n_cls prompts of seq S, width D through L layers, projected to
    # embed dim P; precomputed image features of dim P through the adapter.
    N_CLS, S, D, H, P, L = 4, 8, 32, 4, 16, 2
    N_CTX = 3
    B_IMG = 2
    RATIO = 0.2
    TB = 2                      # prompts per grid step (TB*S rows per matmul)

    root = jax.random.PRNGKey(0)
    k_par, k_img, k_tok = jax.random.split(root, 3)
    params = init_params(k_par, L=L, D=D, P=P, S=S, H=H,
                         n_cls=N_CLS, n_ctx=N_CTX, C_img=P)

    image_features = jax.random.normal(k_img, (B_IMG, P), jnp.float32)
    # synthetic token ids; the EOT token (largest id) marks the row to gather
    tok = jax.random.randint(k_tok, (N_CLS, S), 1, 100)
    eot_pos = jnp.array([5, 6, 7, 4], jnp.int32)
    tokenized = tok.at[jnp.arange(N_CLS), eot_pos].set(1000).astype(jnp.int32)

    logits, img_f, txt_f = custom_clip_forward(
        image_features, tokenized, params, num_heads=H, tb=TB, ratio=RATIO)
    logits = jax.block_until_ready(logits)

    ref_logits, ref_img, ref_txt = reference_forward(
        image_features, tokenized, params, num_heads=H, ratio=RATIO)

    assert logits.shape == (B_IMG, N_CLS)
    assert jnp.allclose(txt_f, ref_txt, atol=5e-3, rtol=5e-3), "text features mismatch"
    assert jnp.allclose(img_f, ref_img, atol=5e-3, rtol=5e-3), "image features mismatch"
    assert jnp.allclose(logits, ref_logits, atol=2e-2, rtol=2e-2), "logits mismatch"

    print("KERNEL_OK")
</pallas_src>

<mosaic_0001>
module attributes {stable_mosaic.version = 11 : i64} {
  func.func @_adapter_kernel(%arg0: memref<2x16xf32, #tpu.memory_space<vmem>>, %arg1: memref<16x4xbf16, #tpu.memory_space<vmem>>, %arg2: memref<4x16xbf16, #tpu.memory_space<vmem>>, %arg3: memref<2x16xf32, #tpu.memory_space<vmem>>) attributes {dimension_semantics = [], scalar_prefetch = 0 : i64, scratch_operands = 0 : i64, tpu.core_type = #tpu.core_type<tc>} {
    %c0 = arith.constant 0 : index
    %c0_0 = arith.constant 0 : index
    %0 = vector.load %arg0[%c0, %c0_0] : memref<2x16xf32, #tpu.memory_space<vmem>>, vector<2x16xf32>
    %1 = arith.truncf %0 : vector<2x16xf32> to vector<2x16xbf16>
    %c0_1 = arith.constant 0 : index
    %c0_2 = arith.constant 0 : index
    %2 = vector.load %arg1[%c0_1, %c0_2] : memref<16x4xbf16, #tpu.memory_space<vmem>>, vector<16x4xbf16>
    %cst = arith.constant dense<0.000000e+00> : vector<2x4xf32>
    %3 = tpu.matmul %1, %2, %cst {dimension_numbers = #tpu.dot_dimension_numbers<[1], [0], [0], [1], [0, 0, 1, 1], [], []>} : vector<2x16xbf16>, vector<16x4xbf16>, vector<2x4xf32> -> vector<2x4xf32>
    %cst_3 = arith.constant 0.000000e+00 : f32
    %4 = vector.broadcast %cst_3 : f32 to vector<2x4xf32>
    %5 = arith.maximumf %3, %4 : vector<2x4xf32>
    %6 = arith.truncf %5 : vector<2x4xf32> to vector<2x4xbf16>
    %c0_4 = arith.constant 0 : index
    %c0_5 = arith.constant 0 : index
    %7 = vector.load %arg2[%c0_4, %c0_5] : memref<4x16xbf16, #tpu.memory_space<vmem>>, vector<4x16xbf16>
    %cst_6 = arith.constant dense<0.000000e+00> : vector<2x16xf32>
    %8 = tpu.matmul %6, %7, %cst_6 {dimension_numbers = #tpu.dot_dimension_numbers<[1], [0], [0], [1], [0, 0, 1, 1], [], []>} : vector<2x4xbf16>, vector<4x16xbf16>, vector<2x16xf32> -> vector<2x16xf32>
    %cst_7 = arith.constant 0.000000e+00 : f32
    %9 = vector.broadcast %cst_7 : f32 to vector<2x16xf32>
    %10 = arith.maximumf %8, %9 : vector<2x16xf32>
    %cst_8 = arith.constant 2.000000e-01 : f32
    %11 = vector.broadcast %cst_8 : f32 to vector<2x16xf32>
    %12 = arith.mulf %11, %10 : vector<2x16xf32>
    %cst_9 = arith.constant 8.000000e-01 : f32
    %13 = vector.broadcast %cst_9 : f32 to vector<2x16xf32>
    %14 = arith.mulf %13, %0 : vector<2x16xf32>
    %15 = arith.addf %12, %14 : vector<2x16xf32>
    %c0_10 = arith.constant 0 : index
    %c0_11 = arith.constant 0 : index
    %16 = vector.load %arg3[%c0_10, %c0_11] : memref<2x16xf32, #tpu.memory_space<vmem>>, vector<2x16xf32>
    tpu.vector_store %arg3[%c0_10, %c0_11], %15 {strides = array<i32>} : memref<2x16xf32, #tpu.memory_space<vmem>>, vector<2x16xf32>,
    return
  }
}

</mosaic_0001>

<bundles_post_ra>
// kernel: tpu_custom_call.1
= control target key start
LH: loop header
LB: loop body
LE: loop exit
PB: predicated region body
PF: predicated region fallthrough
CT: control target
= control target key end

     0   :  { %v186_v1 = vmov 0.0   ;;  %s221_s0 = inlined_call_operand.vmem [shape: f32[2,16], index: 0, kind: input, shape index: {}]   ;;  %s222_s1 = inlined_call_operand.vmem [shape: bf16[16,4], index: 1, kind: input, shape index: {}]   ;;  %s223_s2 = inlined_call_operand.vmem [shape: bf16[4,16], index: 2, kind: input, shape index: {}]   ;;  %s224_s3 = inlined_call_operand.hbm [shape: f32[2,16], index: 3, kind: output, shape index: {}]  }
   0x1   :  { %v163_v0 = vld [vmem:[%s222_s1] sm:$0xff]   ;;  %148 = vmatprep.subr.bf16.mxu0 %v186_v1  ;;  %154 = vmatprep.subr.bf16.mxu1 %v186_v1 }
   0x2   :  { %v16_v2 = vld [vmem:[%s221_s0] sm:$0x3] }
   0x3   :  { %8 = vsyncpa [#allocation3], 0  ;;  %149 = vmatpush3.bf16.msra.mxu0 %v163_v0  ;;  %vm187_vm0 = vmmov 0   ;;  %v17_v3 = vpack.c.bf16 %v16_v2, %v16_v2  ;;  %vm26_vm1 = vcmask 130048   ;;  %v72_v4 = vld [vmem:[%s223_s2] sm:$0x3] }
   0x4   :  { %150 = vmatprep.mubr.msk.bf16.mxu0 %vm187_vm0, %v186_v1  ;;  %156 = vmatprep.mubr.msk.bf16.mxu1 %vm187_vm0, %v186_v1  ;;  %vm77_vm2 = vcmask 1041408   ;;  %vm73_vm3 = vcmask 31744   ;;  %v123_v14 = vmul.f32 0.8, %v16_v2  ;;  %s188_s0 = smov [#allocation2]   ;;  %vm125_vm4 = vcmask 123904  }
   0x5   :  { %v79_v5 = vsel %vm77_vm2, %v72_v4, 0  ;;  %s133_s1 = sshll.u32 %s188_s0, 4  ;;  %s134_s1 = int_to_ptr.vmem [resolvable:$true] %s133_s1 }
   0x6   :  { %151 = vmatmul.mubr.msk.bf16.vlgmr.msra.gmra.mxu0 %vm26_vm1, %v17_v3  ;;  %155 = vmatpush3.bf16.msra.mxu1 %v79_v5  ;;  %s164_s2 = scalar_lea.vmem %s134_s1, 32  ;;  %p169_p1 = scmp.lt.s32.totalorder %s134_s1, %s134_s1 }
   0x7   :  { %p165_p0 = scmp.ne.s32.totalorder %s134_s1, %s164_s2  ;;  %p170_p2 = scmp.lt.s32.totalorder %s164_s2, %s164_s2 }
   0x9   :  { %p171_p3 = por %p170_p2, %p169_p1 }
   0xb   :  { %p172_p4 = pnand %p171_p3, %p165_p0 }
  0xc6   :  { %v64_v6 = vpop.f32.mrf.mxu0 }
  0xc7   :  { %v70_v7 = vmax.f32 %v64_v6, 0.0 }
  0xc8   :  { %v152_v8 = vpop.f32.mrf.mxu0 }
  0xc9   :  { %v71_v9 = vpack.c.bf16 %v70_v7, %v70_v7 }
  0xca   :  { %v67_v10 = vpop.f32.mrf.mxu0 }
  0xcb   :  { %157 = vmatmul.mubr.msk.bf16.vlgmr.msra.gmra.mxu1 %vm73_vm3, %v71_v9 }
  0xcc   :  { %v153_v11 = vpop.f32.mrf.mxu0 }
 0x18b   :  { %v115_v12 = vpop.f32.mrf.mxu1 }
 0x18c   :  { %v121_v13 = vmax.f32 %v115_v12, 0.0 }
 0x18d   :  { %v158_v15 = vpop.f32.mrf.mxu1 }
 0x18e   :  { %v122_v16 = vmul.f32 0.2, %v121_v13 }
 0x18f   :  { %v118_v17 = vpop.f32.mrf.mxu1 }
 0x190   :  { %v124_v18 = vadd.f32 %v123_v14, %v122_v16 }
 0x191   :  { %v159_v19 = vpop.f32.mrf.mxu1 }
 0x192   :  { %126 = vst.msk [vmem:[#allocation2] sm:$0x3] %vm125_vm4, %v124_v18 }
 0x193   :  { %175 = shalt.err (!%p172_p4)
}
 0x194   :  { %136 = dma.vmem_to_hbm [thread:$0]  %s134_s1, 32, %s224_s3, [#allocation3]  }
 0x195   :  { %184 = dma.done.wait [#allocation3], 32  }
 0x196   :  { %185 = vsyncadd [#allocation3], 4294967264 }
 0x197   :  { %140 = vsyncpa [#allocation3], 1 }

</bundles_post_ra>
